<compile_context>
chip_gen: v5e
topology: v5e:2x2
jax: 0.10.0
libtpu: 0.0.40
codegen_flags: <defaults>
</compile_context>

<pallas_src>
import functools

import jax
import jax.numpy as jnp
from jax.experimental import pallas as pl
from jax.experimental.pallas import tpu as pltpu


def _round_up(x, m):
    return ((x + m - 1) // m) * m


def _dec_kernel(x_ref, w1_ref, b1_ref, w2_ref, b2_ref, o_ref):
    # First Linear: (tm, K) bf16 @ (K, H) bf16 -> f32 accumulate, + (1, H) f32 bias.
    h = jnp.dot(x_ref[...], w1_ref[...], preferred_element_type=jnp.float32)
    h = jnp.maximum(h + b1_ref[...], 0.0)
    # Second Linear: bf16 operands on the MXU, f32 accumulate, f32 bias.
    h = h.astype(w2_ref.dtype)
    out = jnp.dot(h, w2_ref[...], preferred_element_type=jnp.float32)
    o_ref[...] = (out + b2_ref[...]).astype(o_ref.dtype)


@functools.partial(jax.jit, static_argnames=("tm",))
def cat_root_to_leaf_dec(parent_d_vec, w1, b1, w2, b2, *, tm=256):
    """parent_d_vec: (B, d*7); w1: (d*7, h); b1: (h,); w2: (h, d); b2: (d,).

    Weights are pre-transposed to (in, out) so the kernel does plain row-major
    matmuls (y = x @ W + b), matching torch.nn.Linear semantics.
    """
    B, K = parent_d_vec.shape
    H = w1.shape[1]
    D = w2.shape[1]

    # --- lane-dense output padding (100 -> 128) ------------------------------
    Dp = _round_up(max(D, 128), 128)

    # --- dtype prep: bf16 weights/activations, f32 biases --------------------
    x_bf = parent_d_vec.astype(jnp.bfloat16)
    w1_bf = w1.astype(jnp.bfloat16)
    w2_bf = jnp.zeros((H, Dp), jnp.bfloat16).at[:, :D].set(w2.astype(jnp.bfloat16))
    b1_2d = b1.reshape(1, H).astype(jnp.float32)
    b2_2d = jnp.zeros((1, Dp), jnp.float32).at[:, :D].set(b2.astype(jnp.float32))

    # --- batch tiling (pad B to a multiple of the batch tile, >= 8 sublanes) --
    tm_eff = min(tm, _round_up(B, 8))
    B_pad = _round_up(B, tm_eff)
    nb = B_pad // tm_eff
    if B_pad != B:
        x_bf = jnp.zeros((B_pad, K), jnp.bfloat16).at[:B].set(x_bf)

    # Advisory cost estimate: this op is dominated by the weight DMA bytes.
    bytes_accessed = (
        B_pad * K * 2          # x (bf16)
        + K * H * 2            # w1 (bf16)
        + H * 4                # b1 (f32)
        + H * Dp * 2           # w2 (bf16, padded)
        + Dp * 4               # b2 (f32, padded)
        + B_pad * Dp * 4       # output (f32)
    )
    cost = pl.CostEstimate(
        flops=2 * B_pad * K * H + 2 * B_pad * H * Dp,
        transcendentals=0,
        bytes_accessed=bytes_accessed,
    )

    out = pl.pallas_call(
        _dec_kernel,
        out_shape=jax.ShapeDtypeStruct((B_pad, Dp), jnp.float32),
        grid=(nb,),
        in_specs=[
            # x tiles over the batch grid axis.
            pl.BlockSpec((tm_eff, K), lambda i: (i, 0)),
            # Weights / biases: constant index_map -> fetched once, VMEM-resident.
            pl.BlockSpec((K, H), lambda i: (0, 0)),
            pl.BlockSpec((1, H), lambda i: (0, 0)),
            pl.BlockSpec((H, Dp), lambda i: (0, 0)),
            pl.BlockSpec((1, Dp), lambda i: (0, 0)),
        ],
        out_specs=pl.BlockSpec((tm_eff, Dp), lambda i: (i, 0)),
        compiler_params=pltpu.CompilerParams(
            dimension_semantics=("parallel",),   # v7x: split batch tiles over 2 TCs
            vmem_limit_bytes=8 << 20,            # realistic budget (footprint < 2 MiB)
        ),
        cost_estimate=cost,
    )(x_bf, w1_bf, b1_2d, w2_bf, b2_2d)

    # Strip batch and lane padding.
    return out[:B, :D]


def _reference_f32(x, w1, b1, w2, b2):
    h = jnp.maximum(x @ w1 + b1, 0.0)
    return h @ w2 + b2


def _reference_bf16(x, w1, b1, w2, b2):
    # Emulates the kernel's quantization (bf16 operands, f32 accumulation).
    f32 = jnp.float32
    xb = x.astype(jnp.bfloat16).astype(f32)
    w1b = w1.astype(jnp.bfloat16).astype(f32)
    h = jnp.maximum(xb @ w1b + b1, 0.0)
    hb = h.astype(jnp.bfloat16).astype(f32)
    w2b = w2.astype(jnp.bfloat16).astype(f32)
    return hb @ w2b + b2


if __name__ == "__main__":
    # Module defaults: k=54, d=100, r=28, h=300 -> Linear(700, 300), Linear(300, 100)
    d, h = 100, 300
    in_dim = d * 7
    B = 2

    key = jax.random.PRNGKey(0)
    k_x, k_w1, k_b1, k_w2, k_b2 = jax.random.split(key, 5)

    # Deterministic parameter init (PyTorch-style uniform bounds).
    bound1 = 1.0 / jnp.sqrt(in_dim)
    bound2 = 1.0 / jnp.sqrt(h)
    w1 = jax.random.uniform(k_w1, (in_dim, h), jnp.float32, -bound1, bound1)
    b1 = jax.random.uniform(k_b1, (h,), jnp.float32, -bound1, bound1)
    w2 = jax.random.uniform(k_w2, (h, d), jnp.float32, -bound2, bound2)
    b2 = jax.random.uniform(k_b2, (d,), jnp.float32, -bound2, bound2)

    parent_d_vec = jax.random.normal(k_x, (B, in_dim), jnp.float32)

    out = cat_root_to_leaf_dec(parent_d_vec, w1, b1, w2, b2)
    out = jax.block_until_ready(out)
    assert out.shape == (B, d)

    # Tight check against a bf16-consistent reference (same quantization).
    ref_bf16 = _reference_bf16(parent_d_vec, w1, b1, w2, b2)
    assert jnp.allclose(out, ref_bf16, atol=5e-3, rtol=5e-3)

    # Looser check against the full-f32 reference (bf16 weight cast tolerance).
    ref_f32 = _reference_f32(parent_d_vec, w1, b1, w2, b2)
    assert jnp.allclose(out, ref_f32, atol=5e-2, rtol=5e-2)

    print("KERNEL_OK")
</pallas_src>

<mosaic_0001>
module attributes {stable_mosaic.version = 11 : i64} {
  func.func @_dec_kernel(%arg0: i32, %arg1: memref<8x700xbf16, #tpu.memory_space<vmem>>, %arg2: memref<700x300xbf16, #tpu.memory_space<vmem>>, %arg3: memref<1x300xf32, #tpu.memory_space<vmem>>, %arg4: memref<300x128xbf16, #tpu.memory_space<vmem>>, %arg5: memref<1x128xf32, #tpu.memory_space<vmem>>, %arg6: memref<8x128xf32, #tpu.memory_space<vmem>>) attributes {dimension_semantics = [#tpu.dimension_semantics<parallel>], iteration_bounds = array<i64: 1>, scalar_prefetch = 0 : i64, scratch_operands = 0 : i64, tpu.core_type = #tpu.core_type<tc>, window_params = [{transform_indices = @transform_0, window_bounds = array<i64: 8, 700>}, {pipeline_mode = #tpu.pipeline_mode<synchronous>, transform_indices = @transform_1, window_bounds = array<i64: 700, 300>}, {pipeline_mode = #tpu.pipeline_mode<synchronous>, transform_indices = @transform_2, window_bounds = array<i64: 1, 300>}, {pipeline_mode = #tpu.pipeline_mode<synchronous>, transform_indices = @transform_3, window_bounds = array<i64: 300, 128>}, {pipeline_mode = #tpu.pipeline_mode<synchronous>, transform_indices = @transform_4, window_bounds = array<i64: 1, 128>}, {transform_indices = @transform_5, window_bounds = array<i64: 8, 128>}]} {
    %c0 = arith.constant 0 : index
    %c0_0 = arith.constant 0 : index
    %0 = vector.load %arg1[%c0, %c0_0] : memref<8x700xbf16, #tpu.memory_space<vmem>>, vector<8x700xbf16>
    %c0_1 = arith.constant 0 : index
    %c0_2 = arith.constant 0 : index
    %1 = vector.load %arg2[%c0_1, %c0_2] : memref<700x300xbf16, #tpu.memory_space<vmem>>, vector<700x300xbf16>
    %cst = arith.constant dense<0.000000e+00> : vector<8x300xf32>
    %2 = tpu.matmul %0, %1, %cst {dimension_numbers = #tpu.dot_dimension_numbers<[1], [0], [0], [1], [0, 0, 1, 1], [], []>} : vector<8x700xbf16>, vector<700x300xbf16>, vector<8x300xf32> -> vector<8x300xf32>
    %c0_3 = arith.constant 0 : index
    %c0_4 = arith.constant 0 : index
    %3 = vector.load %arg3[%c0_3, %c0_4] : memref<1x300xf32, #tpu.memory_space<vmem>>, vector<1x300xf32>
    %4 = vector.broadcast %3 : vector<1x300xf32> to vector<8x300xf32>
    %5 = arith.addf %2, %4 : vector<8x300xf32>
    %cst_5 = arith.constant 0.000000e+00 : f32
    %6 = vector.broadcast %cst_5 : f32 to vector<8x300xf32>
    %7 = arith.maximumf %5, %6 : vector<8x300xf32>
    %8 = arith.truncf %7 : vector<8x300xf32> to vector<8x300xbf16>
    %c0_6 = arith.constant 0 : index
    %c0_7 = arith.constant 0 : index
    %9 = vector.load %arg4[%c0_6, %c0_7] : memref<300x128xbf16, #tpu.memory_space<vmem>>, vector<300x128xbf16>
    %cst_8 = arith.constant dense<0.000000e+00> : vector<8x128xf32>
    %10 = tpu.matmul %8, %9, %cst_8 {dimension_numbers = #tpu.dot_dimension_numbers<[1], [0], [0], [1], [0, 0, 1, 1], [], []>} : vector<8x300xbf16>, vector<300x128xbf16>, vector<8x128xf32> -> vector<8x128xf32>
    %c0_9 = arith.constant 0 : index
    %c0_10 = arith.constant 0 : index
    %11 = vector.load %arg5[%c0_9, %c0_10] : memref<1x128xf32, #tpu.memory_space<vmem>>, vector<1x128xf32>
    %12 = vector.broadcast %11 : vector<1x128xf32> to vector<8x128xf32>
    %13 = arith.addf %10, %12 : vector<8x128xf32>
    %c0_11 = arith.constant 0 : index
    %c0_12 = arith.constant 0 : index
    %14 = vector.load %arg6[%c0_11, %c0_12] : memref<8x128xf32, #tpu.memory_space<vmem>>, vector<8x128xf32>
    tpu.vector_store %arg6[%c0_11, %c0_12], %13 {strides = array<i32>} : memref<8x128xf32, #tpu.memory_space<vmem>>, vector<8x128xf32>,
    return
  }
  func.func @transform_0(%arg0: i32) -> (i32, i32) {
    %c0_i32 = arith.constant 0 : i32
    %c0_i32_0 = arith.constant 0 : i32
    return %arg0, %c0_i32 : i32, i32
  }
  func.func @transform_1(%arg0: i32) -> (i32, i32) {
    %c0_i32 = arith.constant 0 : i32
    %c0_i32_0 = arith.constant 0 : i32
    %c0_i32_1 = arith.constant 0 : i32
    return %c0_i32, %c0_i32_0 : i32, i32
  }
  func.func @transform_2(%arg0: i32) -> (i32, i32) {
    %c0_i32 = arith.constant 0 : i32
    %c0_i32_0 = arith.constant 0 : i32
    %c0_i32_1 = arith.constant 0 : i32
    return %c0_i32, %c0_i32_0 : i32, i32
  }
  func.func @transform_3(%arg0: i32) -> (i32, i32) {
    %c0_i32 = arith.constant 0 : i32
    %c0_i32_0 = arith.constant 0 : i32
    %c0_i32_1 = arith.constant 0 : i32
    return %c0_i32, %c0_i32_0 : i32, i32
  }
  func.func @transform_4(%arg0: i32) -> (i32, i32) {
    %c0_i32 = arith.constant 0 : i32
    %c0_i32_0 = arith.constant 0 : i32
    %c0_i32_1 = arith.constant 0 : i32
    return %c0_i32, %c0_i32_0 : i32, i32
  }
  func.func @transform_5(%arg0: i32) -> (i32, i32) {
    %c0_i32 = arith.constant 0 : i32
    %c0_i32_0 = arith.constant 0 : i32
    return %arg0, %c0_i32 : i32, i32
  }
}

</mosaic_0001>

<bundles_post_ra>
// kernel: cat_root_to_leaf_dec.1
= control target key start
LH: loop header
LB: loop body
LE: loop exit
PB: predicated region body
PF: predicated region fallthrough
CT: control target
= control target key end

     0   :  { %vm933_vm0 = vcmask 1045504   ;;  %vm929_vm1 = vcmask 490496   ;;  %vm1338_vm2 = vcmask 359424   ;;  %s3095_s1 = inlined_call_operand.vmem [shape: bf16[700,300], index: 1, kind: input, shape index: {}]   ;;  %s3096_s0 = inlined_call_operand.vmem [shape: bf16[8,700], index: 0, kind: input, shape index: {}]   ;;  %s3097_s3 = inlined_call_operand.vmem [shape: bf16[300,128], index: 3, kind: input, shape index: {}]   ;;  %s3098_s4 = inlined_call_operand.vmem [shape: f32[1,128], index: 4, kind: input, shape index: {}]   ;;  %s3099_s2 = inlined_call_operand.vmem [shape: f32[1,300], index: 2, kind: input, shape index: {}]   ;;  %s3100_s5 = inlined_call_operand.vmem [shape: f32[8,128], index: 5, kind: output, shape index: {}]  }
   0x1   :  { %v1475_v0 = vld [vmem:[%s3095_s1 + $0xa8] sm:$0xf]  ;;  %v2019_v1 = vld [vmem:[%s3095_s1 + $0xb0] sm:$0xf0]  ;;  %v1463_v11 = vld [vmem:[%s3095_s1 + $0x90] sm:$0xf] }
   0x2   :  { %v1571_v2 = vld [vmem:[%s3095_s1 + $0x168] sm:$0xf]  ;;  %v1476_v3 = vor.u32 %v2019_v1, %v1475_v0  ;;  %v2043_v4 = vld [vmem:[%s3095_s1 + $0x170] sm:$0xf0]  ;;  %v2016_v13 = vld [vmem:[%s3095_s1 + $0x98] sm:$0xf0] }
   0x3   :  { %v1667_v5 = vld [vmem:[%s3095_s1 + $0x228] sm:$0xf]  ;;  %v2067_v6 = vld [vmem:[%s3095_s1 + $0x230] sm:$0xf0]  ;;  %v1572_v7 = vor.u32 %v2043_v4, %v1571_v2  ;;  %v1559_v14 = vld [vmem:[%s3095_s1 + $0x150] sm:$0xf]  ;;  %v1464_v16 = vor.u32 %v2016_v13, %v1463_v11 }
   0x4   :  { %v1668_v8 = vor.u32 %v2067_v6, %v1667_v5  ;;  %v1763_v9 = vld [vmem:[%s3095_s1 + $0x2e8] sm:$0xf]  ;;  %v2091_v10 = vld [vmem:[%s3095_s1 + $0x2f0] sm:$0xf0]  ;;  %943 = vmatpush.bf16.msra.mxu0 %v1476_v3  ;;  %v2040_v15 = vld [vmem:[%s3095_s1 + $0x158] sm:$0xf0] }
   0x5   :  { %v1764_v12 = vor.u32 %v2091_v10, %v1763_v9  ;;  %956 = vmatpush.bf16.msra.mxu1 %v1572_v7  ;;  %v1560_v17 = vor.u32 %v2040_v15, %v1559_v14  ;;  %v1655_v18 = vld [vmem:[%s3095_s1 + $0x210] sm:$0xf]  ;;  %v2064_v19 = vld [vmem:[%s3095_s1 + $0x218] sm:$0xf0]  ;;  %v1451_v23 = vld [vmem:[%s3095_s1 + $0x78] sm:$0xf] }
   0x6   :  { %969 = vmatpush.bf16.msra.mxu2 %v1668_v8  ;;  %v1751_v20 = vld [vmem:[%s3095_s1 + $0x2d0] sm:$0xf]  ;;  %v1656_v21 = vor.u32 %v2064_v19, %v1655_v18  ;;  %v2088_v22 = vld [vmem:[%s3095_s1 + $0x2d8] sm:$0xf0]  ;;  %v2013_v24 = vld [vmem:[%s3095_s1 + $0x80] sm:$0xf0] }
   0x7   :  { %982 = vmatpush.bf16.msra.mxu3 %v1764_v12  ;;  %v1752_v25 = vor.u32 %v2088_v22, %v1751_v20  ;;  %v1547_v26 = vld [vmem:[%s3095_s1 + $0x138] sm:$0xf]  ;;  %v2037_v27 = vld [vmem:[%s3095_s1 + $0x140] sm:$0xf0]  ;;  %v1452_v29 = vor.u32 %v2013_v24, %v1451_v23  ;;  %v1439_v35 = vld [vmem:[%s3095_s1 + $0x60] sm:$0xf] }
   0x8   :  { %v1643_v28 = vld [vmem:[%s3095_s1 + $0x1f8] sm:$0xf]  ;;  %944 = vmatpush.bf16.msra.mxu0 %v1464_v16  ;;  %v2061_v30 = vld [vmem:[%s3095_s1 + $0x200] sm:$0xf0]  ;;  %v1548_v33 = vor.u32 %v2037_v27, %v1547_v26  ;;  %v2010_v36 = vld [vmem:[%s3095_s1 + $0x68] sm:$0xf0] }
   0x9   :  { %v1739_v31 = vld [vmem:[%s3095_s1 + $0x2b8] sm:$0xf]  ;;  %v2085_v32 = vld [vmem:[%s3095_s1 + $0x2c0] sm:$0xf0]  ;;  %957 = vmatpush.bf16.msra.mxu1 %v1560_v17  ;;  %v1644_v34 = vor.u32 %v2061_v30, %v1643_v28  ;;  %v1535_v37 = vld [vmem:[%s3095_s1 + $0x120] sm:$0xf]  ;;  %v1440_v44 = vor.u32 %v2010_v36, %v1439_v35 }
   0xa   :  { %970 = vmatpush.bf16.msra.mxu2 %v1656_v21  ;;  %v1740_v38 = vor.u32 %v2085_v32, %v1739_v31  ;;  %v2034_v39 = vld [vmem:[%s3095_s1 + $0x128] sm:$0xf0]  ;;  %v1631_v40 = vld [vmem:[%s3095_s1 + $0x1e0] sm:$0xf]  ;;  %v1427_v47 = vld [vmem:[%s3095_s1 + $0x48] sm:$0xf] }
   0xb   :  { %983 = vmatpush.bf16.msra.mxu3 %v1752_v25  ;;  %v2058_v41 = vld [vmem:[%s3095_s1 + $0x1e8] sm:$0xf0]  ;;  %v1727_v42 = vld [vmem:[%s3095_s1 + $0x2a0] sm:$0xf]  ;;  %v1536_v45 = vor.u32 %v2034_v39, %v1535_v37  ;;  %v2007_v48 = vld [vmem:[%s3095_s1 + $0x50] sm:$0xf0] }
   0xc   :  { %v2082_v43 = vld [vmem:[%s3095_s1 + $0x2a8] sm:$0xf0]  ;;  %945 = vmatpush.bf16.msra.mxu0 %v1452_v29  ;;  %v1632_v46 = vor.u32 %v2058_v41, %v1631_v40  ;;  %v1523_v49 = vld [vmem:[%s3095_s1 + $0x108] sm:$0xf]  ;;  %v2031_v51 = vld [vmem:[%s3095_s1 + $0x110] sm:$0xf0]  ;;  %v1428_v56 = vor.u32 %v2007_v48, %v1427_v47 }
   0xd   :  { %958 = vmatpush.bf16.msra.mxu1 %v1548_v33  ;;  %v1728_v50 = vor.u32 %v2082_v43, %v1727_v42  ;;  %v1619_v52 = vld [vmem:[%s3095_s1 + $0x1c8] sm:$0xf]  ;;  %v2055_v53 = vld [vmem:[%s3095_s1 + $0x1d0] sm:$0xf0]  ;;  %v1524_v57 = vor.u32 %v2031_v51, %v1523_v49  ;;  %v1415_v59 = vld [vmem:[%s3095_s1 + $0x30] sm:$0xf] }
   0xe   :  { %971 = vmatpush.bf16.msra.mxu2 %v1644_v34  ;;  %v1715_v54 = vld [vmem:[%s3095_s1 + $0x288] sm:$0xf]  ;;  %v2079_v55 = vld [vmem:[%s3095_s1 + $0x290] sm:$0xf0]  ;;  %v1620_v58 = vor.u32 %v2055_v53, %v1619_v52  ;;  %v2004_v60 = vld [vmem:[%s3095_s1 + $0x38] sm:$0xf0] }
   0xf   :  { %984 = vmatpush.bf16.msra.mxu3 %v1740_v38  ;;  %v1511_v61 = vld [vmem:[%s3095_s1 + $0xf0] sm:$0xf]  ;;  %v1716_v62 = vor.u32 %v2079_v55, %v1715_v54  ;;  %v2028_v63 = vld [vmem:[%s3095_s1 + $0xf8] sm:$0xf0]  ;;  %v1416_v4 = vor.u32 %v2004_v60, %v1415_v59  ;;  %v1403_v7 = vld [vmem:[%s3095_s1 + $0x18] sm:$0xf] }
  0x10   :  { %946 = vmatpush.bf16.msra.mxu0 %v1440_v44  ;;  %v1607_v0 = vld [vmem:[%s3095_s1 + $0x1b0] sm:$0xf]  ;;  %v2052_v1 = vld [vmem:[%s3095_s1 + $0x1b8] sm:$0xf0]  ;;  %v1512_v5 = vor.u32 %v2028_v63, %v1511_v61  ;;  %v2001_v8 = vld [vmem:[%s3095_s1 + $0x20] sm:$0xf0] }
  0x11   :  { %959 = vmatpush.bf16.msra.mxu1 %v1536_v45  ;;  %v1703_v2 = vld [vmem:[%s3095_s1 + $0x270] sm:$0xf]  ;;  %v2076_v3 = vld [vmem:[%s3095_s1 + $0x278] sm:$0xf0]  ;;  %v1608_v6 = vor.u32 %v2052_v1, %v1607_v0  ;;  %v1499_v9 = vld [vmem:[%s3095_s1 + $0xd8] sm:$0xf]  ;;  %v1404_v17 = vor.u32 %v2001_v8, %v1403_v7 }
  0x12   :  { %972 = vmatpush.bf16.msra.mxu2 %v1632_v46  ;;  %v1704_v10 = vor.u32 %v2076_v3, %v1703_v2  ;;  %v2025_v11 = vld [vmem:[%s3095_s1 + $0xe0] sm:$0xf0]  ;;  %v1595_v12 = vld [vmem:[%s3095_s1 + $0x198] sm:$0xf]  ;;  %v1391_v16 = vld [vmem:[%s3095_s1] sm:$0xf] }
  0x13   :  { %985 = vmatpush.bf16.msra.mxu3 %v1728_v50  ;;  %v2049_v13 = vld [vmem:[%s3095_s1 + $0x1a0] sm:$0xf0]  ;;  %v1691_v14 = vld [vmem:[%s3095_s1 + $0x258] sm:$0xf]  ;;  %v1998_v18 = vld [vmem:[%s3095_s1 + $0x8] sm:$0xf0]  ;;  %v1500_v21 = vor.u32 %v2025_v11, %v1499_v9 }
  0x14   :  { %947 = vmatpush.bf16.msra.mxu0 %v1428_v56  ;;  %v2073_v15 = vld [vmem:[%s3095_s1 + $0x260] sm:$0xf0]  ;;  %v1907_v19 = vld [vmem:[%s3095_s1 + $0x408] sm:$0xf]  ;;  %v2127_v20 = vld [vmem:[%s3095_s1 + $0x410] sm:$0x30]  ;;  %v1596_v22 = vor.u32 %v2049_v13, %v1595_v12  ;;  %v1392_v34 = vor.u32 %v1998_v18, %v1391_v16 }
  0x15   :  { %960 = vmatpush.bf16.msra.mxu1 %v1524_v57  ;;  %v1487_v23 = vld [vmem:[%s3095_s1 + $0xc0] sm:$0xf]  ;;  %v2022_v24 = vld [vmem:[%s3095_s1 + $0xc8] sm:$0xf0]  ;;  %v1692_v26 = vor.u32 %v2073_v15, %v1691_v14  ;;  %v1859_v31 = vld [vmem:[%s3095_s1 + $0x3a8] sm:$0xf]  ;;  %v1908_v33 = vor.u32 %v2127_v20, %v1907_v19 }
  0x16   :  { %973 = vmatpush.bf16.msra.mxu2 %v1620_v58  ;;  %v1583_v25 = vld [vmem:[%s3095_s1 + $0x180] sm:$0xf]  ;;  %v2046_v27 = vld [vmem:[%s3095_s1 + $0x188] sm:$0xf0]  ;;  %v2115_v32 = vld [vmem:[%s3095_s1 + $0x3b0] sm:$0xf0]  ;;  %v1488_v38 = vor.u32 %v2022_v24, %v1487_v23 }
  0x17   :  { %986 = vmatpush.bf16.msra.mxu3 %v1716_v62  ;;  %v1679_v28 = vld [vmem:[%s3095_s1 + $0x240] sm:$0xf]  ;;  %v2070_v30 = vld [vmem:[%s3095_s1 + $0x248] sm:$0xf0]  ;;  %v1477_v36 = vld [vmem:[%s3095_s1 + $0xb4] sm:$0xf0]  ;;  %v1584_v39 = vor.u32 %v2046_v27, %v1583_v25  ;;  %v1860_v44 = vor.u32 %v2115_v32, %v1859_v31 }
  0x18   :  { %948 = vmatpush.bf16.msra.mxu0 %v1416_v4  ;;  %v21_v29 = vld [vmem:[%s3096_s0] sm:$0xff]  ;;  %v2018_v35 = vld [vmem:[%s3095_s1 + $0xac] sm:$0xf]  ;;  %v1573_v41 = vld [vmem:[%s3095_s1 + $0x174] sm:$0xf0]  ;;  %v1680_v43 = vor.u32 %v2070_v30, %v1679_v28  ;;  %v935_v47 = vsel %vm933_vm0, %v1908_v33, 0 }
  0x19   :  { %961 = vmatpush.bf16.msra.mxu1 %v1512_v5  ;;  %v212_v37 = vunpack.c.h.b16 %v21_v29  ;;  %v2042_v40 = vld [vmem:[%s3095_s1 + $0x16c] sm:$0xf]  ;;  %v211_v42 = vunpack.c.l.b16 %v21_v29  ;;  %v1847_v45 = vld [vmem:[%s3095_s1 + $0x390] sm:$0xf]  ;;  %v1480_v48 = vor.u32 %v2018_v35, %v1477_v36  ;;  %v2112_v49 = vld [vmem:[%s3095_s1 + $0x398] sm:$0xf0] }
  0x1a   :  { %974 = vmatpush.bf16.msra.mxu2 %v1608_v6  ;;  %v22_v46 = vld [vmem:[%s3096_s0 + $0x8] sm:$0xff]  ;;  %v1895_v50 = vld [vmem:[%s3095_s1 + $0x3f0] sm:$0xf]  ;;  %v1576_v53 = vor.u32 %v2042_v40, %v1573_v41  ;;  %v2124_v54 = vld [vmem:[%s3095_s1 + $0x3f8] sm:$0xf0]  ;;  %v1848_v62 = vor.u32 %v2112_v49, %v1847_v45 }
  0x1b   :  { %987 = vmatpush.bf16.msra.mxu3 %v1704_v10  ;;  %v213_v51 = vunpack.c.l.b16 %v22_v46  ;;  %v214_v52 = vunpack.c.h.b16 %v22_v46  ;;  %v2015_v55 = vld [vmem:[%s3095_s1 + $0x94] sm:$0xf]  ;;  %v1465_v56 = vld [vmem:[%s3095_s1 + $0x9c] sm:$0xf0]  ;;  %v2420_v57 = vpack.c.b16 %v212_v37, %v212_v37  ;;  %v2430_v61 = vpack.c.b16 %v211_v42, %v211_v42  ;;  %v1835_v2 = vld [vmem:[%s3095_s1 + $0x378] sm:$0xf] }
  0x1c   :  { %949 = vmatpush.bf16.msra.mxu0 %v1404_v17  ;;  %v2039_v58 = vld [vmem:[%s3095_s1 + $0x154] sm:$0xf]  ;;  %v1561_v59 = vld [vmem:[%s3095_s1 + $0x15c] sm:$0xf0]  ;;  %v1896_v0 = vor.u32 %v2124_v54, %v1895_v50  ;;  %v1468_v1 = vor.u32 %v2015_v55, %v1465_v56  ;;  %v2109_v3 = vld [vmem:[%s3095_s1 + $0x380] sm:$0xf0] }
  0x1d   :  { %962 = vmatpush.bf16.msra.mxu1 %v1500_v21  ;;  %v2428_v60 = vpack.c.b16 %v213_v51, %v213_v51  ;;  %v2432_v63 = vpack.c.b16 %v214_v52, %v214_v52  ;;  %v1883_v4 = vld [vmem:[%s3095_s1 + $0x3d8] sm:$0xf]  ;;  %v1564_v5 = vor.u32 %v2039_v58, %v1561_v59  ;;  %v2121_v6 = vld [vmem:[%s3095_s1 + $0x3e0] sm:$0xf0]  ;;  %v2012_v7 = vld [vmem:[%s3095_s1 + $0x7c] sm:$0xf]  ;;  %v1836_v11 = vor.u32 %v2109_v3, %v1835_v2 }
  0x1e   :  { %975 = vmatpush.bf16.msra.mxu2 %v1596_v22  ;;  %v1453_v8 = vld [vmem:[%s3095_s1 + $0x84] sm:$0xf0]  ;;  %v2036_v9 = vld [vmem:[%s3095_s1 + $0x13c] sm:$0xf]  ;;  %v1823_v12 = vld [vmem:[%s3095_s1 + $0x360] sm:$0xf]  ;;  %v1884_v13 = vor.u32 %v2121_v6, %v1883_v4 }
  0x1f   :  { %988 = vmatpush.bf16.msra.mxu3 %v1692_v26  ;;  %v1549_v10 = vld [vmem:[%s3095_s1 + $0x144] sm:$0xf0]  ;;  %v1456_v14 = vor.u32 %v2012_v7, %v1453_v8  ;;  %v2106_v15 = vld [vmem:[%s3095_s1 + $0x368] sm:$0xf0]  ;;  %v1871_v16 = vld [vmem:[%s3095_s1 + $0x3c0] sm:$0xf] }
  0x20   :  { %950 = vmatpush.bf16.msra.mxu0 %v1392_v34  ;;  %v2118_v17 = vld [vmem:[%s3095_s1 + $0x3c8] sm:$0xf0]  ;;  %v1552_v18 = vor.u32 %v2036_v9, %v1549_v10  ;;  %v2009_v19 = vld [vmem:[%s3095_s1 + $0x64] sm:$0xf]  ;;  %v1441_v20 = vld [vmem:[%s3095_s1 + $0x6c] sm:$0xf0]  ;;  %v1824_v25 = vor.u32 %v2106_v15, %v1823_v12 }
  0x21   :  { %963 = vmatpush.bf16.msra.mxu1 %v1488_v38  ;;  %v2033_v21 = vld [vmem:[%s3095_s1 + $0x124] sm:$0xf]  ;;  %v1537_v22 = vld [vmem:[%s3095_s1 + $0x12c] sm:$0xf0]  ;;  %v2066_v23 = vld [vmem:[%s3095_s1 + $0x22c] sm:$0xf]  ;;  %v1872_v26 = vor.u32 %v2118_v17, %v1871_v16  ;;  %v1444_v27 = vor.u32 %v2009_v19, %v1441_v20 }
  0x22   :  { %976 = vmatpush.bf16.msra.mxu2 %v1584_v39  ;;  %v1669_v24 = vld [vmem:[%s3095_s1 + $0x234] sm:$0xf0]  ;;  %v1811_v28 = vld [vmem:[%s3095_s1 + $0x348] sm:$0xf]  ;;  %v2103_v29 = vld [vmem:[%s3095_s1 + $0x350] sm:$0xf0]  ;;  %v1540_v30 = vor.u32 %v2033_v21, %v1537_v22 }
  0x23   :  { %989 = vmatpush.bf16.msra.mxu3 %v1680_v43  ;;  %951 = vmatmul.bf16.vlgmr.msra.gmra.mxu0 %v2430_v61  ;;  %v1672_v31 = vor.u32 %v2066_v23, %v1669_v24  ;;  %v2006_v32 = vld [vmem:[%s3095_s1 + $0x4c] sm:$0xf]  ;;  %v1429_v33 = vld [vmem:[%s3095_s1 + $0x54] sm:$0xf0]  ;;  %v2063_v36 = vld [vmem:[%s3095_s1 + $0x214] sm:$0xf]  ;;  %v1812_v38 = vor.u32 %v2103_v29, %v1811_v28 }
  0x24   :  { %995 = vmatpush.bf16.msrb.mxu0 %v1860_v44  ;;  %964 = vmatmul.bf16.vlgmr.msra.gmra.mxu1 %v2420_v57  ;;  %v2030_v34 = vld [vmem:[%s3095_s1 + $0x10c] sm:$0xf]  ;;  %v1525_v35 = vld [vmem:[%s3095_s1 + $0x114] sm:$0xf0]  ;;  %v1657_v37 = vld [vmem:[%s3095_s1 + $0x21c] sm:$0xf0]  ;;  %v1432_v39 = vor.u32 %v2006_v32, %v1429_v33 }
  0x25   :  { %1012 = vmatpush.bf16.msrb.mxu1 %v935_v47  ;;  %977 = vmatmul.bf16.vlgmr.msra.gmra.mxu2 %v2428_v60  ;;  %v1799_v40 = vld [vmem:[%s3095_s1 + $0x330] sm:$0xf]  ;;  %v2100_v41 = vld [vmem:[%s3095_s1 + $0x338] sm:$0xf0]  ;;  %v1528_v43 = vor.u32 %v2030_v34, %v1525_v35  ;;  %v1660_v44 = vor.u32 %v2063_v36, %v1657_v37  ;;  %v2003_v45 = vld [vmem:[%s3095_s1 + $0x34] sm:$0xf] }
  0x26   :  { %1021 = vmatpush.bf16.msrb.mxu2 %v1480_v48  ;;  %990 = vmatmul.bf16.vlgmr.msra.gmra.mxu3 %v2432_v63  ;;  %v2525_v42 = vld [vmem:[%s3096_s0 + $0x10] sm:$0xff]  ;;  %v1417_v46 = vld [vmem:[%s3095_s1 + $0x3c] sm:$0xf0]  ;;  %v2060_v50 = vld [vmem:[%s3095_s1 + $0x1fc] sm:$0xf]  ;;  %v1800_v52 = vor.u32 %v2100_v41, %v1799_v40 }
  0x27   :  { %1034 = vmatpush.bf16.msrb.mxu3 %v1576_v53  ;;  %v2027_v47 = vld [vmem:[%s3095_s1 + $0xf4] sm:$0xf]  ;;  %v216_v48 = vunpack.c.h.b16 %v2525_v42  ;;  %v1513_v49 = vld [vmem:[%s3095_s1 + $0xfc] sm:$0xf0]  ;;  %v1645_v51 = vld [vmem:[%s3095_s1 + $0x204] sm:$0xf0]  ;;  %v1420_v54 = vor.u32 %v2003_v45, %v1417_v46 }
  0x28   :  { %996 = vmatpush.bf16.msrb.mxu0 %v1848_v62  ;;  %v1787_v55 = vld [vmem:[%s3095_s1 + $0x318] sm:$0xf]  ;;  %v2097_v56 = vld [vmem:[%s3095_s1 + $0x320] sm:$0xf0]  ;;  %v1516_v58 = vor.u32 %v2027_v47, %v1513_v49  ;;  %v1648_v59 = vor.u32 %v2060_v50, %v1645_v51  ;;  %v2000_v62 = vld [vmem:[%s3095_s1 + $0x1c] sm:$0xf] }
  0x29   :  { %1013 = vmatpush.bf16.msrb.mxu1 %v1896_v0  ;;  %v2546_v53 = vpack.c.b16 %v216_v48, %v216_v48  ;;  %v1405_v0 = vld [vmem:[%s3095_s1 + $0x24] sm:$0xf0]  ;;  %v2057_v3 = vld [vmem:[%s3095_s1 + $0x1e4] sm:$0xf]  ;;  %v1633_v4 = vld [vmem:[%s3095_s1 + $0x1ec] sm:$0xf0] }
  0x2a   :  { %1022 = vmatpush.bf16.msrb.mxu2 %v1468_v1  ;;  %v2024_v1 = vld [vmem:[%s3095_s1 + $0xdc] sm:$0xf]  ;;  %v1501_v2 = vld [vmem:[%s3095_s1 + $0xe4] sm:$0xf0]  ;;  %v1775_v6 = vld [vmem:[%s3095_s1 + $0x300] sm:$0xf]  ;;  %v1408_v9 = vor.u32 %v2000_v62, %v1405_v0 }
  0x2b   :  { %1035 = vmatpush.bf16.msrb.mxu3 %v1564_v5  ;;  %v1788_v5 = vor.u32 %v2097_v56, %v1787_v55  ;;  %v2126_v7 = vld [vmem:[%s3095_s1 + $0x40c] sm:$0xf]  ;;  %v1909_v8 = vld [vmem:[%s3095_s1 + $0x414] sm:$0x30]  ;;  %v1393_v12 = vld [vmem:[%s3095_s1 + $0xc] sm:$0xf0] }
  0x2c   :  { %997 = vmatpush.bf16.msrb.mxu0 %v1836_v11  ;;  %v2094_v10 = vld [vmem:[%s3095_s1 + $0x308] sm:$0xf0]  ;;  %v1997_v11 = vld [vmem:[%s3095_s1 + $0x4] sm:$0xf]  ;;  %v1765_v17 = vld [vmem:[%s3095_s1 + $0x2f4] sm:$0xf0]  ;;  %v1912_v21 = vor.u32 %v2126_v7, %v1909_v8 }
  0x2d   :  { %1014 = vmatpush.bf16.msrb.mxu1 %v1884_v13  ;;  %v1504_v13 = vor.u32 %v2024_v1, %v1501_v2  ;;  %v2021_v15 = vld [vmem:[%s3095_s1 + $0xc4] sm:$0xf]  ;;  %v2090_v16 = vld [vmem:[%s3095_s1 + $0x2ec] sm:$0xf]  ;;  %v1621_v20 = vld [vmem:[%s3095_s1 + $0x1d4] sm:$0xf0]  ;;  %v1776_v22 = vor.u32 %v2094_v10, %v1775_v6 }
  0x2e   :  { %1023 = vmatpush.bf16.msrb.mxu2 %v1456_v14  ;;  %v1636_v14 = vor.u32 %v2057_v3, %v1633_v4  ;;  %v2054_v19 = vld [vmem:[%s3095_s1 + $0x1cc] sm:$0xf]  ;;  %v1861_v24 = vld [vmem:[%s3095_s1 + $0x3b4] sm:$0xf0]  ;;  %v1753_v32 = vld [vmem:[%s3095_s1 + $0x2dc] sm:$0xf0] }
  0x2f   :  { %1036 = vmatpush.bf16.msrb.mxu3 %v1552_v18  ;;  %v1489_v18 = vld [vmem:[%s3095_s1 + $0xcc] sm:$0xf0]  ;;  %v2114_v23 = vld [vmem:[%s3095_s1 + $0x3ac] sm:$0xf]  ;;  %v1624_v29 = vor.u32 %v2054_v19, %v1621_v20  ;;  %v938_v34 = vsel %vm933_vm0, %v1912_v21, 0 }
  0x30   :  { %998 = vmatpush.bf16.msrb.mxu0 %v1824_v25  ;;  %v215_v25 = vunpack.c.l.b16 %v2525_v42  ;;  %v1492_v28 = vor.u32 %v2021_v15, %v1489_v18  ;;  %v1864_v33 = vor.u32 %v2114_v23, %v1861_v24  ;;  %v1609_v35 = vld [vmem:[%s3095_s1 + $0x1bc] sm:$0xf0]  ;;  %v2111_v36 = vld [vmem:[%s3095_s1 + $0x394] sm:$0xf]  ;;  %v2048_v47 = vld [vmem:[%s3095_s1 + $0x19c] sm:$0xf] }
  0x31   :  { %1015 = vmatpush.bf16.msrb.mxu1 %v1872_v26  ;;  %v1396_v26 = vor.u32 %v1997_v11, %v1393_v12  ;;  %v1897_v40 = vld [vmem:[%s3095_s1 + $0x3fc] sm:$0xf0]  ;;  %v1597_v48 = vld [vmem:[%s3095_s1 + $0x1a4] sm:$0xf0]  ;;  %v2108_v49 = vld [vmem:[%s3095_s1 + $0x37c] sm:$0xf] }
  0x32   :  { %1024 = vmatpush.bf16.msrb.mxu2 %v1444_v27  ;;  %v1768_v27 = vor.u32 %v2090_v16, %v1765_v17  ;;  %v2633_v37 = vpack.c.b16 %v215_v25, %v215_v25  ;;  %v1837_v50 = vld [vmem:[%s3095_s1 + $0x384] sm:$0xf0]  ;;  %v2120_v51 = vld [vmem:[%s3095_s1 + $0x3dc] sm:$0xf]  ;;  %v1600_v55 = vor.u32 %v2048_v47, %v1597_v48  ;;  %v2045_v56 = vld [vmem:[%s3095_s1 + $0x184] sm:$0xf] }
  0x33   :  { %1037 = vmatpush.bf16.msrb.mxu3 %v1540_v30  ;;  %v2051_v30 = vld [vmem:[%s3095_s1 + $0x1b4] sm:$0xf]  ;;  %v1840_v62 = vor.u32 %v2108_v49, %v1837_v50  ;;  %v1585_v1 = vld [vmem:[%s3095_s1 + $0x18c] sm:$0xf0]  ;;  %v2105_v2 = vld [vmem:[%s3095_s1 + $0x364] sm:$0xf] }
  0x34   :  { %999 = vmatpush.bf16.msrb.mxu0 %v1812_v38  ;;  %1917 = vmatmul.msk.bf16.vlgmr.msrb.gmra.mxu1 %vm929_vm1, %v2546_v53  ;;  %v1849_v38 = vld [vmem:[%s3095_s1 + $0x39c] sm:$0xf0]  ;;  %v1612_v42 = vor.u32 %v2051_v30, %v1609_v35  ;;  %v1825_v3 = vld [vmem:[%s3095_s1 + $0x36c] sm:$0xf0]  ;;  %v2117_v4 = vld [vmem:[%s3095_s1 + $0x3c4] sm:$0xf]  ;;  %v1588_v11 = vor.u32 %v2045_v56, %v1585_v1 }
  0x35   :  { %1047 = vmatpush.bf16.msra.mxu1 %v1672_v31  ;;  %v2087_v31 = vld [vmem:[%s3095_s1 + $0x2d4] sm:$0xf]  ;;  %v1852_v45 = vor.u32 %v2111_v36, %v1849_v38  ;;  %v1483_v6 = vld [vmem:[%s3095_s1 + $0xb0] sm:$0xf]  ;;  %v2020_v8 = vld [vmem:[%s3095_s1 + $0xb8] sm:$0xf0] }
  0x36   :  { %1025 = vmatpush.bf16.msrb.mxu2 %v1432_v39  ;;  %v2123_v39 = vld [vmem:[%s3095_s1 + $0x3f4] sm:$0xf]  ;;  %v1756_v41 = vor.u32 %v2087_v31, %v1753_v32  ;;  %v2044_v10 = vld [vmem:[%s3095_s1 + $0x178] sm:$0xf0]  ;;  %v2078_v12 = vld [vmem:[%s3095_s1 + $0x28c] sm:$0xf]  ;;  %v1484_v16 = vor.u32 %v2020_v8, %v1483_v6 }
  0x37   :  { %1038 = vmatpush.bf16.msrb.mxu3 %v1528_v43  ;;  %v2084_v43 = vld [vmem:[%s3095_s1 + $0x2bc] sm:$0xf]  ;;  %v1900_v46 = vor.u32 %v2123_v39, %v1897_v40  ;;  %v2102_v18 = vld [vmem:[%s3095_s1 + $0x34c] sm:$0xf]  ;;  %v1813_v19 = vld [vmem:[%s3095_s1 + $0x354] sm:$0xf0] }
  0x38   :  { %1000 = vmatpush.bf16.msrb.mxu0 %v1800_v52  ;;  %v1885_v52 = vld [vmem:[%s3095_s1 + $0x3e4] sm:$0xf0]  ;;  %v1471_v20 = vld [vmem:[%s3095_s1 + $0x98] sm:$0xf]  ;;  %v2041_v24 = vld [vmem:[%s3095_s1 + $0x160] sm:$0xf0] }
  0x39   :  { %1048 = vmatpush.bf16.msra.mxu1 %v1660_v44  ;;  %v1741_v44 = vld [vmem:[%s3095_s1 + $0x2c4] sm:$0xf0]  ;;  %v1888_v0 = vor.u32 %v2120_v51, %v1885_v52  ;;  %v1567_v23 = vld [vmem:[%s3095_s1 + $0x158] sm:$0xf]  ;;  %v2075_v25 = vld [vmem:[%s3095_s1 + $0x274] sm:$0xf] }
  0x3a   :  { %1026 = vmatpush.bf16.msrb.mxu2 %v1420_v54  ;;  %v1744_v54 = vor.u32 %v2084_v43, %v1741_v44  ;;  %v2099_v30 = vld [vmem:[%s3095_s1 + $0x334] sm:$0xf]  ;;  %v1801_v31 = vld [vmem:[%s3095_s1 + $0x33c] sm:$0xf0]  ;;  %v2038_v36 = vld [vmem:[%s3095_s1 + $0x148] sm:$0xf0] }
  0x3b   :  { %1039 = vmatpush.bf16.msrb.mxu3 %v1516_v58  ;;  %v2081_v58 = vld [vmem:[%s3095_s1 + $0x2a4] sm:$0xf]  ;;  %v1459_v32 = vld [vmem:[%s3095_s1 + $0x80] sm:$0xf]  ;;  %v2072_v38 = vld [vmem:[%s3095_s1 + $0x25c] sm:$0xf]  ;;  %v1804_v40 = vor.u32 %v2099_v30, %v1801_v31 }
  0x3c   :  { %1001 = vmatpush.bf16.msrb.mxu0 %v1788_v5  ;;  %v1873_v5 = vld [vmem:[%s3095_s1 + $0x3cc] sm:$0xf0]  ;;  %v1555_v35 = vld [vmem:[%s3095_s1 + $0x140] sm:$0xf]  ;;  %v1693_v39 = vld [vmem:[%s3095_s1 + $0x264] sm:$0xf0] }
  0x3d   :  { %1049 = vmatpush.bf16.msra.mxu1 %v1648_v59  ;;  %v1729_v59 = vld [vmem:[%s3095_s1 + $0x2ac] sm:$0xf0]  ;;  %v1876_v15 = vor.u32 %v2117_v4, %v1873_v5  ;;  %v2096_v43 = vld [vmem:[%s3095_s1 + $0x31c] sm:$0xf]  ;;  %v1789_v44 = vld [vmem:[%s3095_s1 + $0x324] sm:$0xf0] }
  0x3e   :  { %1027 = vmatpush.bf16.msrb.mxu2 %v1408_v9  ;;  %v1732_v7 = vor.u32 %v2081_v58, %v1729_v59  ;;  %v1579_v9 = vld [vmem:[%s3095_s1 + $0x170] sm:$0xf]  ;;  %v2011_v47 = vld [vmem:[%s3095_s1 + $0x70] sm:$0xf0]  ;;  %v1543_v48 = vld [vmem:[%s3095_s1 + $0x128] sm:$0xf]  ;;  %v1792_v52 = vor.u32 %v2096_v43, %v1789_v44 }
  0x3f   :  { %1040 = vmatpush.bf16.msrb.mxu3 %v1504_v13  ;;  %v1717_v13 = vld [vmem:[%s3095_s1 + $0x294] sm:$0xf0]  ;;  %v1580_v17 = vor.u32 %v2044_v10, %v1579_v9  ;;  %v2035_v49 = vld [vmem:[%s3095_s1 + $0x130] sm:$0xf0]  ;;  %v2069_v50 = vld [vmem:[%s3095_s1 + $0x244] sm:$0xf] }
  0x40   :  { %1002 = vmatpush.bf16.msrb.mxu0 %v1776_v22  ;;  %v1720_v21 = vor.u32 %v2078_v12, %v1717_v13  ;;  %v2017_v22 = vld [vmem:[%s3095_s1 + $0xa0] sm:$0xf0]  ;;  %v1681_v51 = vld [vmem:[%s3095_s1 + $0x24c] sm:$0xf0]  ;;  %v1544_v58 = vor.u32 %v2035_v49, %v1543_v48  ;;  %v2092_v4 = vld [vmem:[%s3095_s1 + $0x2f8] sm:$0xf0] }
  0x41   :  { %1050 = vmatpush.bf16.msra.mxu1 %v1636_v14  ;;  %v1828_v14 = vor.u32 %v2105_v2, %v1825_v3  ;;  %v2093_v59 = vld [vmem:[%s3095_s1 + $0x304] sm:$0xf]  ;;  %v1684_v1 = vor.u32 %v2069_v50, %v1681_v51  ;;  %v2008_v2 = vld [vmem:[%s3095_s1 + $0x58] sm:$0xf0]  ;;  %v1771_v3 = vld [vmem:[%s3095_s1 + $0x2f0] sm:$0xf] }
  0x42   :  { %1028 = vmatpush.bf16.msrb.mxu2 %v1396_v26  ;;  %v1705_v26 = vld [vmem:[%s3095_s1 + $0x27c] sm:$0xf0]  ;;  %v1531_v5 = vld [vmem:[%s3095_s1 + $0x110] sm:$0xf]  ;;  %v2032_v6 = vld [vmem:[%s3095_s1 + $0x118] sm:$0xf0]  ;;  %v1772_v12 = vor.u32 %v2092_v4, %v1771_v3 }
  0x43   :  { %1041 = vmatpush.bf16.msrb.mxu3 %v1492_v28  ;;  %1003 = vmatmul.bf16.vlgmr.msrb.gmra.mxu0 %v2633_v37  ;;  %v1472_v28 = vor.u32 %v2017_v22, %v1471_v20  ;;  %v1663_v9 = vld [vmem:[%s3095_s1 + $0x218] sm:$0xf]  ;;  %v2065_v10 = vld [vmem:[%s3095_s1 + $0x220] sm:$0xf0]  ;;  %v2062_v22 = vld [vmem:[%s3095_s1 + $0x208] sm:$0xf0] }
  0x44   :  { %1060 = vmatpush.bf16.msra.mxu0 %v1768_v27  ;;  %v1816_v27 = vor.u32 %v2102_v18, %v1813_v19  ;;  %v1423_v13 = vld [vmem:[%s3095_s1 + $0x38] sm:$0xf]  ;;  %v2029_v19 = vld [vmem:[%s3095_s1 + $0x100] sm:$0xf0]  ;;  %v1664_v20 = vor.u32 %v2065_v10, %v1663_v9  ;;  %v1507_v30 = vld [vmem:[%s3095_s1 + $0xe0] sm:$0xf] }
  0x45   :  { %1051 = vmatpush.bf16.msra.mxu1 %v1624_v29  ;;  %1029 = vmatmul.bf16.vlgmr.msrb.gmra.mxu2 %v2430_v61  ;;  %v1568_v29 = vor.u32 %v2041_v24, %v1567_v23  ;;  %v1519_v18 = vld [vmem:[%s3095_s1 + $0xf8] sm:$0xf]  ;;  %v2026_v31 = vld [vmem:[%s3095_s1 + $0xe8] sm:$0xf0]  ;;  %v1735_v43 = vld [vmem:[%s3095_s1 + $0x2a8] sm:$0xf] }
  0x46   :  { %1073 = vmatpush.bf16.msra.mxu2 %v1864_v33  ;;  %1042 = vmatmul.bf16.vlgmr.msrb.gmra.mxu3 %v2420_v57  ;;  %v1708_v33 = vor.u32 %v2075_v25, %v1705_v26  ;;  %v1411_v25 = vld [vmem:[%s3095_s1 + $0x20] sm:$0xf]  ;;  %v1520_v26 = vor.u32 %v2029_v19, %v1519_v18  ;;  %v2083_v44 = vld [vmem:[%s3095_s1 + $0x2b0] sm:$0xf0]  ;;  %v1867_v48 = vld [vmem:[%s3095_s1 + $0x3b0] sm:$0xf] }
  0x47   :  { %1090 = vmatpush.bf16.msra.mxu3 %v938_v34  ;;  %v2014_v34 = vld [vmem:[%s3095_s1 + $0x88] sm:$0xf0]  ;;  %v2116_v49 = vld [vmem:[%s3095_s1 + $0x3b8] sm:$0xf0]  ;;  %v1627_v50 = vld [vmem:[%s3095_s1 + $0x1d0] sm:$0xf] }
  0x48   :  { %1061 = vmatpush.bf16.msra.mxu0 %v1756_v41  ;;  %v1460_v41 = vor.u32 %v2014_v34, %v1459_v32  ;;  %v1639_v34 = vld [vmem:[%s3095_s1 + $0x1e8] sm:$0xf]  ;;  %v2056_v51 = vld [vmem:[%s3095_s1 + $0x1d8] sm:$0xf0]  ;;  %v1615_v3 = vld [vmem:[%s3095_s1 + $0x1b8] sm:$0xf] }
  0x49   :  { %1052 = vmatpush.bf16.msra.mxu1 %v1612_v42  ;;  %v1556_v42 = vor.u32 %v2038_v36, %v1555_v35  ;;  %v2059_v35 = vld [vmem:[%s3095_s1 + $0x1f0] sm:$0xf0]  ;;  %v2053_v4 = vld [vmem:[%s3095_s1 + $0x1c0] sm:$0xf0]  ;;  %v1711_v10 = vld [vmem:[%s3095_s1 + $0x278] sm:$0xf] }
  0x4a   :  { %1074 = vmatpush.bf16.msra.mxu2 %v1852_v45  ;;  %v1447_v45 = vld [vmem:[%s3095_s1 + $0x68] sm:$0xf]  ;;  %v1891_v18 = vld [vmem:[%s3095_s1 + $0x3e0] sm:$0xf]  ;;  %v2122_v19 = vld [vmem:[%s3095_s1 + $0x3e8] sm:$0xf0] }
  0x4b   :  { %1091 = vmatpush.bf16.msra.mxu3 %v1900_v46  ;;  %v1696_v46 = vor.u32 %v2072_v38, %v1693_v39  ;;  %v1448_v56 = vor.u32 %v2011_v47, %v1447_v45  ;;  %v1999_v39 = vld [vmem:[%s3095_s1 + $0x10] sm:$0xf0]  ;;  %v1495_v45 = vld [vmem:[%s3095_s1 + $0xc8] sm:$0xf]  ;;  %v1640_v47 = vor.u32 %v2059_v35, %v1639_v34  ;;  %v1819_v35 = vld [vmem:[%s3095_s1 + $0x350] sm:$0xf] }
  0x4c   :  { %1062 = vmatpush.bf16.msra.mxu0 %v1744_v54  ;;  %v1675_v54 = vld [vmem:[%s3095_s1 + $0x230] sm:$0xf] }
  0x4d   :  { %1053 = vmatpush.bf16.msra.mxu1 %v1600_v55  ;;  %v2068_v55 = vld [vmem:[%s3095_s1 + $0x238] sm:$0xf0] }
  0x4e   :  { %1075 = vmatpush.bf16.msra.mxu2 %v1840_v62  ;;  %v1777_v62 = vld [vmem:[%s3095_s1 + $0x30c] sm:$0xf0] }
  0x4f   :  { %1092 = vmatpush.bf16.msra.mxu3 %v1888_v0  ;;  %v1435_v0 = vld [vmem:[%s3095_s1 + $0x50] sm:$0xf]  ;;  %v1780_v8 = vor.u32 %v2093_v59, %v1777_v62  ;;  %v2080_v62 = vld [vmem:[%s3095_s1 + $0x298] sm:$0xf0] }
  0x50   :  { %1063 = vmatpush.bf16.msra.mxu0 %v1732_v7  ;;  %v1676_v7 = vor.u32 %v2068_v55, %v1675_v54  ;;  %v1736_v55 = vor.u32 %v2083_v44, %v1735_v43  ;;  %v1723_v59 = vld [vmem:[%s3095_s1 + $0x290] sm:$0xf]  ;;  %v1795_v44 = vld [vmem:[%s3095_s1 + $0x320] sm:$0xf] }
  0x51   :  { %1054 = vmatpush.bf16.msra.mxu1 %v1588_v11  ;;  %v1436_v11 = vor.u32 %v2008_v2, %v1435_v0  ;;  %v1855_v0 = vld [vmem:[%s3095_s1 + $0x398] sm:$0xf]  ;;  %v2113_v2 = vld [vmem:[%s3095_s1 + $0x3a0] sm:$0xf0] }
  0x52   :  { %1076 = vmatpush.bf16.msra.mxu2 %v1828_v14  ;;  %v1532_v14 = vor.u32 %v2032_v6, %v1531_v5  ;;  %v1903_v6 = vld [vmem:[%s3095_s1 + $0x3f8] sm:$0xf]  ;;  %v1856_v9 = vor.u32 %v2113_v2, %v1855_v0  ;;  %v2143_v2 = vld [vmem:[%s3097_s3 + $0x70] sm:$0xff] }
  0x53   :  { %1093 = vmatpush.bf16.msra.mxu3 %v1876_v15  ;;  %v2005_v15 = vld [vmem:[%s3095_s1 + $0x40] sm:$0xf0] }
  0x54   :  { %1064 = vmatpush.bf16.msra.mxu0 %v1720_v21  ;;  %1055 = vmatmul.bf16.vlgmr.msra.gmra.mxu1 %v2428_v60  ;;  %v1651_v21 = vld [vmem:[%s3095_s1 + $0x200] sm:$0xf]  ;;  %v1424_v23 = vor.u32 %v2005_v15, %v1423_v13 }
  0x55   :  { %1099 = vmatpush.bf16.msrb.mxu1 %v1484_v16  ;;  %v1759_v16 = vld [vmem:[%s3095_s1 + $0x2d8] sm:$0xf]  ;;  %v1652_v32 = vor.u32 %v2062_v22, %v1651_v21  ;;  %v1843_v13 = vld [vmem:[%s3095_s1 + $0x380] sm:$0xf]  ;;  %v2074_v22 = vld [vmem:[%s3095_s1 + $0x268] sm:$0xf0] }
  0x56   :  { %1077 = vmatpush.bf16.msra.mxu2 %v1816_v27  ;;  %1918 = vmatmul.msk.bf16.vlgmr.msra.gmra.mxu3 %vm929_vm1, %v2546_v53  ;;  %v2002_v27 = vld [vmem:[%s3095_s1 + $0x28] sm:$0xf0] }
  0x57   :  { %1112 = vmatpush.bf16.msrb.mxu3 %v1580_v17  ;;  %v2089_v17 = vld [vmem:[%s3095_s1 + $0x2e0] sm:$0xf0]  ;;  %v1412_v36 = vor.u32 %v2002_v27, %v1411_v25  ;;  %v1892_v25 = vor.u32 %v2122_v19, %v1891_v18  ;;  %v2047_v27 = vld [vmem:[%s3095_s1 + $0x190] sm:$0xf0] }
  0x58   :  { %1065 = vmatpush.bf16.msra.mxu0 %v1708_v33  ;;  %v1760_v24 = vor.u32 %v2089_v17, %v1759_v16  ;;  %v1399_v33 = vld [vmem:[%s3095_s1 + $0x8] sm:$0xf]  ;;  %v1603_v16 = vld [vmem:[%s3095_s1 + $0x1a0] sm:$0xf]  ;;  %v2050_v17 = vld [vmem:[%s3095_s1 + $0x1a8] sm:$0xf0] }
  0x59   :  { %1100 = vmatpush.bf16.msrb.mxu1 %v1472_v28  ;;  %v1747_v28 = vld [vmem:[%s3095_s1 + $0x2c0] sm:$0xf]  ;;  %v1400_v54 = vor.u32 %v1999_v39, %v1399_v33  ;;  %v2071_v33 = vld [vmem:[%s3095_s1 + $0x250] sm:$0xf0] }
  0x5a   :  { %1078 = vmatpush.bf16.msra.mxu2 %v1804_v40  ;;  %v1915_v40 = vld [vmem:[%s3095_s1 + $0x410] sm:$0xf] }
  0x5b   :  { %1113 = vmatpush.bf16.msrb.mxu3 %v1568_v29  ;;  %v2086_v29 = vld [vmem:[%s3095_s1 + $0x2c8] sm:$0xf0] }
  0x5c   :  { %1066 = vmatpush.bf16.msra.mxu0 %v1696_v46  ;;  %v1748_v38 = vor.u32 %v2086_v29, %v1747_v28  ;;  %v2023_v46 = vld [vmem:[%s3095_s1 + $0xd0] sm:$0xf0]  ;;  %v1879_v28 = vld [vmem:[%s3095_s1 + $0x3c8] sm:$0xf] }
  0x5d   :  { %1101 = vmatpush.bf16.msrb.mxu1 %v1460_v41  ;;  %v2128_v41 = vld [vmem:[%s3095_s1 + $0x418] sm:$0x30]  ;;  %v2119_v29 = vld [vmem:[%s3095_s1 + $0x3d0] sm:$0xf0] }
  0x5e   :  { %1079 = vmatpush.bf16.msra.mxu2 %v1792_v52  ;;  %v1916_v52 = vor.u32 %v2128_v41, %v1915_v40  ;;  %v1807_v41 = vld [vmem:[%s3095_s1 + $0x338] sm:$0xf] }
  0x5f   :  { %1114 = vmatpush.bf16.msrb.mxu3 %v1556_v42  ;;  %v1508_v42 = vor.u32 %v2026_v31, %v1507_v30 }
  0x60   :  { %1067 = vmatpush.bf16.msra.mxu0 %v1684_v1  ;;  %v1628_v1 = vor.u32 %v2056_v51, %v1627_v50  ;;  %v941_v5 = vsel %vm933_vm0, %v1916_v52, 0  ;;  %v2133_v50 = vld [vmem:[%s3097_s3 + $0x20] sm:$0xff]  ;;  %v2132_v51 = vld [vmem:[%s3097_s3 + $0x18] sm:$0xff]  ;;  %v2130_v52 = vld [vmem:[%s3097_s3 + $0x8] sm:$0xff] }
  0x61   :  { %1102 = vmatpush.bf16.msrb.mxu1 %v1448_v56  ;;  %v1496_v56 = vor.u32 %v2023_v46, %v1495_v45  ;;  %v2098_v45 = vld [vmem:[%s3095_s1 + $0x328] sm:$0xf0] }
  0x62   :  { %1080 = vmatpush.bf16.msra.mxu2 %v1780_v8  ;;  %v1724_v8 = vor.u32 %v2080_v62, %v1723_v59  ;;  %v1796_v46 = vor.u32 %v2098_v45, %v1795_v44  ;;  %v2144_v59 = vld [vmem:[%s3097_s3 + $0x78] sm:$0xff]  ;;  %v2146_v45 = vld [vmem:[%s3097_s3 + $0x88] sm:$0xff] }
  0x63   :  { %1115 = vmatpush.bf16.msrb.mxu3 %v1544_v58  ;;  %1068 = vmatmul.bf16.vlgmr.msra.gmra.mxu0 %v2432_v63  ;;  %v1868_v58 = vor.u32 %v2116_v49, %v1867_v48  ;;  %v2136_v48 = vld [vmem:[%s3097_s3 + $0x38] sm:$0xff] }
  0x64   :  { %1125 = vmatpush.bf16.msrb.mxu0 %v1676_v7  ;;  %v2125_v7 = vld [vmem:[%s3095_s1 + $0x400] sm:$0xf0] }
  0x65   :  { %1103 = vmatpush.bf16.msrb.mxu1 %v1436_v11  ;;  %1081 = vmatmul.bf16.vlgmr.msra.gmra.mxu2 %v2633_v37  ;;  %v2077_v11 = vld [vmem:[%s3095_s1 + $0x280] sm:$0xf0]  ;;  %v1904_v15 = vor.u32 %v2125_v7, %v1903_v6 }
  0x66   :  { %1138 = vmatpush.bf16.msrb.mxu2 %v1772_v12  ;;  %v1616_v12 = vor.u32 %v2053_v4, %v1615_v3  ;;  %v3053_v3 = vld [vmem:[%s3099_s2] sm:$0x7] }
  0x67   :  { %1116 = vmatpush.bf16.msrb.mxu3 %v1532_v14  ;;  %v2110_v14 = vld [vmem:[%s3095_s1 + $0x388] sm:$0xf0]  ;;  %v202_v4 = vperm.slane %v3053_v3, 0 }
  0x68   :  { %1126 = vmatpush.bf16.msrb.mxu0 %v1664_v20  ;;  %v1712_v20 = vor.u32 %v2077_v11, %v1711_v10  ;;  %v1844_v21 = vor.u32 %v2110_v14, %v1843_v13  ;;  %v2141_v10 = vld [vmem:[%s3097_s3 + $0x60] sm:$0xff]  ;;  %v2140_v14 = vld [vmem:[%s3097_s3 + $0x58] sm:$0xff] }
  0x69   :  { %1104 = vmatpush.bf16.msrb.mxu1 %v1424_v23  ;;  %v1604_v23 = vor.u32 %v2050_v17, %v1603_v16 }
  0x6a   :  { %1139 = vmatpush.bf16.msrb.mxu2 %v1760_v24  ;;  %v1831_v24 = vld [vmem:[%s3095_s1 + $0x368] sm:$0xf] }
  0x6b   :  { %1117 = vmatpush.bf16.msrb.mxu3 %v1520_v26  ;;  %v1591_v26 = vld [vmem:[%s3095_s1 + $0x188] sm:$0xf] }
  0x6c   :  { %1127 = vmatpush.bf16.msrb.mxu0 %v1652_v32  ;;  %v1687_v32 = vld [vmem:[%s3095_s1 + $0x248] sm:$0xf]  ;;  %v1592_v34 = vor.u32 %v2047_v27, %v1591_v26 }
  0x6d   :  { %1105 = vmatpush.bf16.msrb.mxu1 %v1412_v36  ;;  %v2104_v36 = vld [vmem:[%s3095_s1 + $0x358] sm:$0xf0]  ;;  %v1688_v39 = vor.u32 %v2071_v33, %v1687_v32 }
  0x6e   :  { %1140 = vmatpush.bf16.msrb.mxu2 %v1748_v38  ;;  %v1880_v38 = vor.u32 %v2119_v29, %v1879_v28  ;;  %v1820_v40 = vor.u32 %v2104_v36, %v1819_v35  ;;  %v203_v28 = vperm.slane %v3053_v3, 1  ;;  %v1994_v36 = vld [vmem:[%s3097_s3 + $0x90] sm:$0xf] }
  0x6f   :  { %1118 = vmatpush.bf16.msrb.mxu3 %v1508_v42  ;;  %v2101_v42 = vld [vmem:[%s3095_s1 + $0x340] sm:$0xf0] }
  0x70   :  { %1128 = vmatpush.bf16.msrb.mxu0 %v1640_v47  ;;  %v1808_v43 = vor.u32 %v2101_v42, %v1807_v41  ;;  %v2095_v47 = vld [vmem:[%s3095_s1 + $0x310] sm:$0xf0] }
  0x71   :  { %1106 = vmatpush.bf16.msrb.mxu1 %v1400_v54 }
  0x72   :  { %1141 = vmatpush.bf16.msrb.mxu2 %v1736_v55 }
  0x73   :  { %1119 = vmatpush.bf16.msrb.mxu3 %v1496_v56  ;;  %v2129_v56 = vld [vmem:[%s3097_s3] sm:$0xff] }
  0x74   :  { %1129 = vmatpush.bf16.msrb.mxu0 %v1628_v1  ;;  %1107 = vmatmul.bf16.vlgmr.msrb.gmra.mxu1 %v2430_v61  ;;  %v1699_v61 = vld [vmem:[%s3095_s1 + $0x260] sm:$0xf] }
  0x75   :  { %1151 = vmatpush.bf16.msra.mxu1 %v1868_v58  ;;  %v1700_v30 = vor.u32 %v2074_v22, %v1699_v61 }
  0x76   :  { %1120 = vmatmul.bf16.vlgmr.msrb.gmra.mxu3 %v2420_v57  ;;  %1142 = vmatpush.bf16.msrb.mxu2 %v1724_v8  ;;  %v2107_v57 = vld [vmem:[%s3095_s1 + $0x370] sm:$0xf0] }
  0x77   :  { %1168 = vmatpush.bf16.msra.mxu3 %v941_v5  ;;  %v1832_v31 = vor.u32 %v2107_v57, %v1831_v24  ;;  %v2142_v5 = vld [vmem:[%s3097_s3 + $0x68] sm:$0xff]  ;;  %v2137_v57 = vld [vmem:[%s3097_s3 + $0x40] sm:$0xff] }
  0x78   :  { %1130 = vmatpush.bf16.msrb.mxu0 %v1616_v12 }
  0x79   :  { %1152 = vmatpush.bf16.msra.mxu1 %v1856_v9 }
  0x7a   :  { %1143 = vmatpush.bf16.msrb.mxu2 %v1712_v20  ;;  %v2138_v20 = vld [vmem:[%s3097_s3 + $0x48] sm:$0xff] }
  0x7b   :  { %1169 = vmatpush.bf16.msra.mxu3 %v1904_v15  ;;  %v2139_v15 = vld [vmem:[%s3097_s3 + $0x50] sm:$0xff] }
  0x7c   :  { %1131 = vmatpush.bf16.msrb.mxu0 %v1604_v23 }
  0x7d   :  { %1153 = vmatpush.bf16.msra.mxu1 %v1844_v21 }
  0x7e   :  { %1144 = vmatpush.bf16.msrb.mxu2 %v1700_v30 }
  0x7f   :  { %1170 = vmatpush.bf16.msra.mxu3 %v1892_v25 }
  0x80   :  { %1132 = vmatpush.bf16.msrb.mxu0 %v1592_v34 }
  0x81   :  { %1154 = vmatpush.bf16.msra.mxu1 %v1832_v31 }
  0x82   :  { %1145 = vmatpush.bf16.msrb.mxu2 %v1688_v39 }
  0x83   :  { %1171 = vmatpush.bf16.msra.mxu3 %v1880_v38  ;;  %1133 = vmatmul.bf16.vlgmr.msrb.gmra.mxu0 %v2428_v60  ;;  %v1783_v60 = vld [vmem:[%s3095_s1 + $0x308] sm:$0xf]  ;;  %v2147_v38 = vld [vmem:[%s3097_s3 + $0x90] sm:$0x30] }
  0x84   :  { %v1784_v49 = vor.u32 %v2095_v47, %v1783_v60  ;;  %1345 = vmatpush.bf16.msra.mxu0 %v2136_v48 }
  0x85   :  { %1155 = vmatpush.bf16.msra.mxu1 %v1820_v40  ;;  %1146 = vmatmul.bf16.vlgmr.msrb.gmra.mxu2 %v2432_v63  ;;  %v2135_v63 = vld [vmem:[%s3097_s3 + $0x30] sm:$0xff]  ;;  %v1995_v40 = vor.u32 %v2147_v38, %v1994_v36 }
  0x86   :  { %1919 = vmatmul.msk.bf16.vlgmr.msra.gmra.mxu3 %vm929_vm1, %v2546_v53  ;;  %v2134_v53 = vld [vmem:[%s3097_s3 + $0x28] sm:$0xff]  ;;  %1358 = vmatpush.bf16.msra.mxu2 %v2144_v59 }
  0x87   :  { %v1343_v44 = vsel %vm933_vm0, %v1995_v40, 0 }
  0x88   :  { %1346 = vmatpush.bf16.msra.mxu0 %v2135_v63  ;;  %1376 = vmatpush.bf16.msrb.mxu3 %v1343_v44  ;;  %v2145_v63 = vld [vmem:[%s3097_s3 + $0x80] sm:$0xff] }
  0x89   :  { %1156 = vmatpush.bf16.msra.mxu1 %v1808_v43 }
  0x8a   :  { %1359 = vmatpush.bf16.msra.mxu2 %v2143_v2 }
  0x8c   :  { %1347 = vmatpush.bf16.msra.mxu0 %v2134_v53  ;;  %1377 = vmatpush.bf16.msrb.mxu3 %v2146_v45 }
  0x8d   :  { %1157 = vmatpush.bf16.msra.mxu1 %v1796_v46 }
  0x8e   :  { %1360 = vmatpush.bf16.msra.mxu2 %v2142_v5 }
  0x90   :  { %1348 = vmatpush.bf16.msra.mxu0 %v2133_v50  ;;  %1378 = vmatpush.bf16.msrb.mxu3 %v2145_v63 }
  0x91   :  { %1158 = vmatpush.bf16.msra.mxu1 %v1784_v49 }
  0x92   :  { %1361 = vmatpush.bf16.msra.mxu2 %v2141_v10 }
  0x94   :  { %1159 = vmatmul.bf16.vlgmr.msra.gmra.mxu1 %v2633_v37  ;;  %1349 = vmatpush.bf16.msra.mxu0 %v2132_v51  ;;  %v2131_v37 = vld [vmem:[%s3097_s3 + $0x10] sm:$0xff]  ;;  %v204_v51 = vperm.slane %v3053_v3, 2 }
  0x96   :  { %1362 = vmatpush.bf16.msra.mxu2 %v2140_v14 }
  0x98   :  { %1350 = vmatpush.bf16.msra.mxu0 %v2131_v37 }
  0x9a   :  { %1363 = vmatpush.bf16.msra.mxu2 %v2139_v15 }
  0x9c   :  { %1351 = vmatpush.bf16.msra.mxu0 %v2130_v52 }
  0x9e   :  { %1364 = vmatpush.bf16.msra.mxu2 %v2138_v20 }
  0xa0   :  { %v952_v55 = vpop.f32.mrf.mxu0  ;;  %1352 = vmatpush.bf16.msra.mxu0 %v2129_v56 }
  0xa1   :  { %v965_v54 = vpop.f32.mrf.mxu1  ;;  %v953_v8 = vadd.f32 %v952_v55, %v202_v4 }
  0xa2   :  { %1365 = vmatpush.bf16.msra.mxu2 %v2137_v57 }
  0xa3   :  { %v966_v11 = vadd.f32 %v965_v54, %v953_v8 }
  0xa8   :  { %v978_v58 = vpop.f32.mrf.mxu2  ;;  %v954_v1 = vpop.f32.mrf.mxu0 }
  0xa9   :  { %v967_v62 = vpop.f32.mrf.mxu1  ;;  %v991_v0 = vpop.f32.mrf.mxu3  ;;  %v979_v12 = vadd.f32 %v978_v58, %v966_v11 }
  0xab   :  { %v992_v16 = vadd.f32 %v991_v0, %v979_v12 }
  0xb0   :  { %v980_v6 = vpop.f32.mrf.mxu2 }
  0xb1   :  { %v993_v7 = vpop.f32.mrf.mxu3  ;;  %v1017_v9 = vpop.f32.mrf.mxu1 }
  0xb9   :  { %v1019_v13 = vpop.f32.mrf.mxu1 }
  0xba   :  { %v2148_v13 = vld [vmem:[%s3098_s4] ss:$0 sm:$0xff] }
  0xc0   :  { %v1004_v17 = vpop.f32.mrf.mxu0 }
  0xc1   :  { %v1005_v18 = vadd.f32 %v1004_v17, %v992_v16 }
  0xc3   :  { %v1018_v19 = vadd.f32 %v1017_v9, %v1005_v18 }
  0xc5   :  { %v1177_v21 = vmax.f32 %v1018_v19, 0.0 }
  0xc7   :  { %v1180_v22 = vpack.c.bf16 %v1177_v21, %v1177_v21 }
  0xc8   :  { %v1030_v61 = vpop.f32.mrf.mxu2  ;;  %v1006_v24 = vpop.f32.mrf.mxu0 }
  0xc9   :  { %v1043_v23 = vpop.f32.mrf.mxu3  ;;  %1353 = vmatmul.bf16.vlgmr.msra.gmra.mxu0 %v1180_v22  ;;  %v1031_v30 = vadd.f32 %v1030_v61, %v203_v28 }
  0xcb   :  { %v1044_v32 = vadd.f32 %v1043_v23, %v1031_v30 }
  0xd0   :  { %v1032_v26 = vpop.f32.mrf.mxu2 }
  0xd1   :  { %v1056_v25 = vpop.f32.mrf.mxu1  ;;  %v1045_v27 = vpop.f32.mrf.mxu3 }
  0xd2   :  { %v1057_v34 = vadd.f32 %v1056_v25, %v1044_v32 }
  0xd9   :  { %v1058_v29 = vpop.f32.mrf.mxu1  ;;  %v1095_v31 = vpop.f32.mrf.mxu3 }
  0xe0   :  { %v1069_v33 = vpop.f32.mrf.mxu0 }
  0xe1   :  { %v1097_v35 = vpop.f32.mrf.mxu3  ;;  %v1070_v39 = vadd.f32 %v1069_v33, %v1057_v34 }
  0xe8   :  { %v1082_v41 = vpop.f32.mrf.mxu2  ;;  %v1071_v43 = vpop.f32.mrf.mxu0 }
  0xe9   :  { %v1083_v42 = vadd.f32 %v1082_v41, %v1070_v39 }
  0xeb   :  { %v1096_v46 = vadd.f32 %v1095_v31, %v1083_v42 }
  0xed   :  { %v1178_v60 = vmax.f32 %v1096_v46, 0.0 }
  0xef   :  { %v1181_v47 = vpack.c.bf16 %v1178_v60, %v1178_v60 }
  0xf0   :  { %v1084_v49 = vpop.f32.mrf.mxu2 }
  0xf1   :  { %v1108_v48 = vpop.f32.mrf.mxu1  ;;  %1366 = vmatmul.bf16.vlgmr.msra.gmra.mxu2 %v1181_v47 }
  0xf2   :  { %v1109_v54 = vadd.f32 %v1108_v48, %v204_v51 }
  0xf9   :  { %v1121_v53 = vpop.f32.mrf.mxu3  ;;  %v1110_v50 = vpop.f32.mrf.mxu1 }
  0xfa   :  { %v1122_v55 = vadd.f32 %v1121_v53, %v1109_v54 }
 0x100   :  { %v1134_v37 = vpop.f32.mrf.mxu0 }
 0x101   :  { %v1123_v52 = vpop.f32.mrf.mxu3  ;;  %v1135_v62 = vadd.f32 %v1134_v37, %v1122_v55 }
 0x108   :  { %v1147_v56 = vpop.f32.mrf.mxu2  ;;  %v1136_v58 = vpop.f32.mrf.mxu0 }
 0x109   :  { %v1173_v59 = vpop.f32.mrf.mxu3  ;;  %v1148_v0 = vadd.f32 %v1147_v56, %v1135_v62 }
 0x110   :  { %v1149_v4 = vpop.f32.mrf.mxu2 }
 0x111   :  { %v1160_v1 = vpop.f32.mrf.mxu1  ;;  %v1175_v5 = vpop.f32.mrf.mxu3 }
 0x112   :  { %v1161_v2 = vadd.f32 %v1160_v1, %v1148_v0 }
 0x114   :  { %v1174_v6 = vadd.f32 %v1173_v59, %v1161_v2 }
 0x116   :  { %v1179_v7 = vmax.f32 %v1174_v6, 0.0 }
 0x118   :  { %v1182_v8 = vpack.c.bf16 %v1179_v7, %v1179_v7 }
 0x119   :  { %v1162_v9 = vpop.f32.mrf.mxu1 }
 0x11a   :  { %1996 = vmatmul.msk.bf16.vlgmr.msrb.gmra.mxu3 %vm1338_vm2, %v1182_v8 }
 0x146   :  { %v1354_v3 = vpop.f32.mrf.mxu0 }
 0x147   :  { %v1355_v14 = vadd.f32 %v2148_v13, %v1354_v3 }
 0x14e   :  { %v1356_v10 = vpop.f32.mrf.mxu0 }
 0x174   :  { %v1367_v11 = vpop.f32.mrf.mxu2 }
 0x175   :  { %v1368_v15 = vadd.f32 %v1367_v11, %v1355_v14 }
 0x17c   :  { %v1369_v12 = vpop.f32.mrf.mxu2 }
 0x19d   :  { %v1380_v16 = vpop.f32.mrf.mxu3 }
 0x19e   :  { %v1381_v17 = vadd.f32 %v1380_v16, %v1368_v15 }
 0x1a0   :  { %1384 = vst [vmem:[%s3100_s5] sm:$0xff] %v1381_v17 }
 0x1a5   :  { %v1382_v18 = vpop.f32.mrf.mxu3 }

</bundles_post_ra>
